<compile_context>
chip_gen: v7x
topology: tpu7x:2x2x1
jax: 0.10.0
libtpu: 0.0.40
codegen_flags: <defaults>
</compile_context>

<pallas_src>
import functools

import jax
import jax.numpy as jnp
from jax import lax
from jax.experimental import pallas as pl
from jax.experimental.pallas import tpu as pltpu


def _lsce_kernel(preds_ref, target_ref, out_ref, *,
                 n_rows, n_classes, tile_n, epsilon):
    x = preds_ref[...].astype(jnp.float32)                  # (tile_n, C)
    tgt = target_ref[...]                                    # (tile_n, 1) int32

    # Row-validity mask: boundary-block padding rows (unspecified contents,
    # possibly NaN/Inf) contribute exactly 0 -- jnp.where selects, so any
    # garbage in the masked-off operand is discarded, never propagated.
    row0 = pl.program_id(0) * tile_n
    row_ids = row0 + lax.broadcasted_iota(jnp.int32, (tile_n, 1), 0)
    valid = row_ids < n_rows                                  # (tile_n, 1) bool

    # Stabilized per-row logZ; log_softmax itself is never materialized.
    m = jnp.max(x, axis=-1, keepdims=True)                    # (tile_n, 1)
    lse = jnp.log(jnp.sum(jnp.exp(x - m), axis=-1, keepdims=True))
    logz = m + lse                                            # (tile_n, 1)

    row_sum_x = jnp.sum(x, axis=-1, keepdims=True)            # (tile_n, 1)

    # x[i, target[i]] via one-hot select on x (no dynamic gather on TPU).
    col = lax.broadcasted_iota(jnp.int32, x.shape, 1)
    sel = jnp.sum(jnp.where(col == tgt, x, 0.0), axis=-1, keepdims=True)

    per_row_neg = jnp.float32(n_classes) * logz - row_sum_x   # -sum_c log_preds
    per_row_nll = logz - sel                                  # -log_preds[i, t_i]

    # Fused epsilon combination: final = eps*(loss/C) + (1-eps)*nll, so the
    # per-row partial (before the mean's 1/N) is:
    w_neg = jnp.float32(epsilon / n_classes)
    w_nll = jnp.float32(1.0 - epsilon)
    per_row = w_neg * per_row_neg + w_nll * per_row_nll       # (tile_n, 1)
    per_row = jnp.where(valid, per_row, jnp.zeros_like(per_row))

    s = jnp.sum(per_row, axis=0, keepdims=True)               # (1, 1)

    # Lane-dense (1, 8, 128) per-block output store (single unmasked vst);
    # the wrapper reads [:, 0, 0] and does the tiny final reduction.
    out_ref[...] = jnp.broadcast_to(s.reshape(1, 1, 1), out_ref.shape)


def _round_up(x, m):
    return ((x + m - 1) // m) * m


def _choose_tile_n(n_rows, n_classes, itemsize):
    # Sublane packing: 8 rows for f32, 16 for bf16, 32 for 8-bit.
    sub = max(8, 32 // max(1, itemsize))
    # Keep one preds tile around <= ~6 MiB of f32-equivalent so the
    # double-buffered input plus f32 temporaries fit comfortably even on v7x.
    budget_bytes = 6 * 1024 * 1024
    lane_padded_c = _round_up(n_classes, 128)
    t = budget_bytes // max(1, lane_padded_c * max(itemsize, 4))
    t = max(sub, min(1024, t))
    t = (t // sub) * sub
    t = min(t, _round_up(n_rows, sub))
    return max(sub, t)


@functools.partial(jax.jit, static_argnames=("epsilon", "reduction", "tile_n"))
def label_smoothing_cross_entropy(preds, target, *, epsilon=0.2,
                                  reduction="mean", tile_n=None):
    """preds: (N, C) float; target: (N,) int. Matches LabelSmoothingCrossEntropy."""
    n_rows, n_classes = preds.shape
    itemsize = jnp.dtype(preds.dtype).itemsize
    if tile_n is None:
        tile_n = _choose_tile_n(n_rows, n_classes, itemsize)

    grid_n = pl.cdiv(n_rows, tile_n)

    target2d = target.astype(jnp.int32).reshape(n_rows, 1)

    kernel = functools.partial(_lsce_kernel, n_rows=n_rows,
                               n_classes=n_classes, tile_n=tile_n,
                               epsilon=float(epsilon))

    cost = pl.CostEstimate(
        flops=8 * n_rows * n_classes,
        transcendentals=n_rows * n_classes + n_rows,
        bytes_accessed=n_rows * n_classes * itemsize + n_rows * 4
        + grid_n * 8 * 128 * 4,
    )

    partials = pl.pallas_call(
        kernel,
        out_shape=jax.ShapeDtypeStruct((grid_n, 8, 128), jnp.float32),
        grid_spec=pltpu.PrefetchScalarGridSpec(
            num_scalar_prefetch=0,
            grid=(grid_n,),
            in_specs=[
                pl.BlockSpec((tile_n, n_classes), lambda i: (i, 0)),
                # (tile_n, 1) int32 target block lane-pads in VMEM; cost is
                # negligible next to the preds tile.
                pl.BlockSpec((tile_n, 1), lambda i: (i, 0)),
            ],
            out_specs=pl.BlockSpec((1, 8, 128), lambda i: (i, 0, 0)),
        ),
        compiler_params=pltpu.CompilerParams(
            dimension_semantics=("parallel",),
            vmem_limit_bytes=48 * 1024 * 1024,
        ),
        cost_estimate=cost,
    )(preds, target2d)

    total = jnp.sum(partials[:, 0, 0])

    if reduction == "mean":
        return total / n_rows
    elif reduction == "sum":
        return total
    else:
        raise NotImplementedError("reduction='none' is not supported")


def _reference(preds, target, epsilon=0.2):
    log_preds = jax.nn.log_softmax(preds.astype(jnp.float32), axis=-1)
    n = preds.shape[-1]
    loss = jnp.mean(-jnp.sum(log_preds, axis=-1))
    nll = jnp.mean(-jnp.take_along_axis(log_preds, target[:, None], axis=-1)[:, 0])
    return epsilon * (loss / n) + (1.0 - epsilon) * nll


if __name__ == "__main__":
    key = jax.random.PRNGKey(0)
    k1, k2, k3, k4 = jax.random.split(key, 4)

    # Case 1: small f32 problem matching the module's 2-D (N, C) input.
    N1, C1 = 8, 32
    preds1 = jax.random.normal(k1, (N1, C1), dtype=jnp.float32)
    tgt1 = jax.random.randint(k2, (N1,), 0, C1, dtype=jnp.int32)
    out1 = jax.block_until_ready(
        label_smoothing_cross_entropy(preds1, tgt1, epsilon=0.2))
    ref1 = _reference(preds1, tgt1, epsilon=0.2)
    assert jnp.allclose(out1, ref1, atol=1e-5, rtol=1e-5), (out1, ref1)

    # Case 2: N not a multiple of the row tile (exercises the un-padded
    # boundary block + in-kernel masking), bf16 preds (narrow HBM traffic,
    # in-kernel f32 compute).
    N2, C2 = 12, 256
    preds2 = jax.random.normal(k3, (N2, C2), dtype=jnp.float32).astype(jnp.bfloat16)
    tgt2 = jax.random.randint(k4, (N2,), 0, C2, dtype=jnp.int32)
    out2 = jax.block_until_ready(
        label_smoothing_cross_entropy(preds2, tgt2, epsilon=0.2))
    ref2 = _reference(preds2, tgt2, epsilon=0.2)
    assert jnp.allclose(out2, ref2, atol=2e-4, rtol=2e-4), (out2, ref2)

    # Case 3: reduction='sum' path.
    out3 = jax.block_until_ready(
        label_smoothing_cross_entropy(preds1, tgt1, epsilon=0.2, reduction="sum"))
    ref3 = _reference(preds1, tgt1, epsilon=0.2) * N1
    assert jnp.allclose(out3, ref3, atol=1e-4, rtol=1e-5), (out3, ref3)

    print("KERNEL_OK")
</pallas_src>

<mosaic_0001>
module attributes {stable_mosaic.version = 11 : i64} {
  func.func @_lsce_kernel(%arg0: i32, %arg1: memref<8x32xf32, #tpu.memory_space<vmem>>, %arg2: memref<8x1xi32, #tpu.memory_space<vmem>>, %arg3: memref<1x8x128xf32, #tpu.memory_space<vmem>>) attributes {dimension_semantics = [#tpu.dimension_semantics<parallel>], iteration_bounds = array<i64: 1>, scalar_prefetch = 0 : i64, scratch_operands = 0 : i64, tpu.core_type = #tpu.core_type<tc>, window_params = [{transform_indices = @transform_0, window_bounds = array<i64: 8, 32>}, {transform_indices = @transform_1, window_bounds = array<i64: 8, 1>}, {transform_indices = @transform_2, window_bounds = array<i64: 1, 8, 128>}]} {
    %c0 = arith.constant 0 : index
    %c0_0 = arith.constant 0 : index
    %0 = vector.load %arg1[%c0, %c0_0] : memref<8x32xf32, #tpu.memory_space<vmem>>, vector<8x32xf32>
    %c0_1 = arith.constant 0 : index
    %c0_2 = arith.constant 0 : index
    %1 = vector.load %arg2[%c0_1, %c0_2] : memref<8x1xi32, #tpu.memory_space<vmem>>, vector<8x1xi32>
    %c8_i32 = arith.constant 8 : i32
    %2 = arith.muli %arg0, %c8_i32 : i32
    %3 = tpu.iota {dimensions = array<i32: 0>} : vector<8x1xi32>
    %4 = vector.broadcast %2 : i32 to vector<8x1xi32>
    %5 = arith.addi %4, %3 : vector<8x1xi32>
    %c8_i32_3 = arith.constant 8 : i32
    %6 = vector.broadcast %c8_i32_3 : i32 to vector<8x1xi32>
    %7 = arith.cmpi slt, %5, %6 : vector<8x1xi32>
    %cst = arith.constant dense<0xFF800000> : vector<8xf32>
    %8 = vector.multi_reduction <maximumf>, %0, %cst [1] : vector<8x32xf32> to vector<8xf32>
    %9 = vector.shape_cast %8 : vector<8xf32> to vector<8x1xf32>
    %10 = vector.broadcast %9 : vector<8x1xf32> to vector<8x32xf32>
    %11 = arith.subf %0, %10 : vector<8x32xf32>
    %12 = math.exp %11 : vector<8x32xf32>
    %cst_4 = arith.constant dense<0.000000e+00> : vector<8xf32>
    %13 = vector.multi_reduction <add>, %12, %cst_4 [1] : vector<8x32xf32> to vector<8xf32>
    %14 = vector.shape_cast %13 : vector<8xf32> to vector<8x1xf32>
    %15 = math.log %14 : vector<8x1xf32>
    %16 = arith.addf %9, %15 : vector<8x1xf32>
    %cst_5 = arith.constant dense<0.000000e+00> : vector<8xf32>
    %17 = vector.multi_reduction <add>, %0, %cst_5 [1] : vector<8x32xf32> to vector<8xf32>
    %18 = vector.shape_cast %17 : vector<8xf32> to vector<8x1xf32>
    %19 = tpu.iota {dimensions = array<i32: 1>} : vector<8x32xi32>
    %20 = vector.broadcast %1 : vector<8x1xi32> to vector<8x32xi32>
    %21 = arith.cmpi eq, %19, %20 : vector<8x32xi32>
    %cst_6 = arith.constant 0.000000e+00 : f32
    %22 = vector.broadcast %cst_6 : f32 to vector<8x32xf32>
    %23 = arith.select %21, %0, %22 : vector<8x32xi1>, vector<8x32xf32>
    %cst_7 = arith.constant dense<0.000000e+00> : vector<8xf32>
    %24 = vector.multi_reduction <add>, %23, %cst_7 [1] : vector<8x32xf32> to vector<8xf32>
    %25 = vector.shape_cast %24 : vector<8xf32> to vector<8x1xf32>
    %cst_8 = arith.constant 3.200000e+01 : f32
    %26 = vector.broadcast %cst_8 : f32 to vector<8x1xf32>
    %27 = arith.mulf %26, %16 : vector<8x1xf32>
    %28 = arith.subf %27, %18 : vector<8x1xf32>
    %29 = arith.subf %16, %25 : vector<8x1xf32>
    %cst_9 = arith.constant 6.250000e-03 : f32
    %30 = vector.broadcast %cst_9 : f32 to vector<8x1xf32>
    %31 = arith.mulf %30, %28 : vector<8x1xf32>
    %cst_10 = arith.constant 8.000000e-01 : f32
    %32 = vector.broadcast %cst_10 : f32 to vector<8x1xf32>
    %33 = arith.mulf %32, %29 : vector<8x1xf32>
    %34 = arith.addf %31, %33 : vector<8x1xf32>
    %cst_11 = arith.constant 0.000000e+00 : f32
    %35 = vector.broadcast %cst_11 : f32 to vector<8x1xf32>
    %36 = arith.select %7, %34, %35 : vector<8x1xi1>, vector<8x1xf32>
    %cst_12 = arith.constant dense<0.000000e+00> : vector<1xf32>
    %37 = vector.multi_reduction <add>, %36, %cst_12 [0] : vector<8x1xf32> to vector<1xf32>
    %38 = vector.shape_cast %37 : vector<1xf32> to vector<1x1xf32>
    %39 = vector.shape_cast %38 : vector<1x1xf32> to vector<1x1x1xf32>
    %40 = vector.shape_cast %39 : vector<1x1x1xf32> to vector<1x1x1xf32>
    %41 = vector.broadcast %40 : vector<1x1x1xf32> to vector<1x8x128xf32>
    %c0_13 = arith.constant 0 : index
    %c0_14 = arith.constant 0 : index
    %c0_15 = arith.constant 0 : index
    %42 = vector.load %arg3[%c0_13, %c0_14, %c0_15] : memref<1x8x128xf32, #tpu.memory_space<vmem>>, vector<1x8x128xf32>
    tpu.vector_store %arg3[%c0_13, %c0_14, %c0_15], %41 {strides = array<i32>} : memref<1x8x128xf32, #tpu.memory_space<vmem>>, vector<1x8x128xf32>,
    return
  }
  func.func @transform_0(%arg0: i32) -> (i32, i32) {
    %c0_i32 = arith.constant 0 : i32
    %c0_i32_0 = arith.constant 0 : i32
    return %arg0, %c0_i32 : i32, i32
  }
  func.func @transform_1(%arg0: i32) -> (i32, i32) {
    %c0_i32 = arith.constant 0 : i32
    %c0_i32_0 = arith.constant 0 : i32
    return %arg0, %c0_i32 : i32, i32
  }
  func.func @transform_2(%arg0: i32) -> (i32, i32, i32) {
    %c0_i32 = arith.constant 0 : i32
    %c0_i32_0 = arith.constant 0 : i32
    %c0_i32_1 = arith.constant 0 : i32
    return %arg0, %c0_i32, %c0_i32_0 : i32, i32, i32
  }
}

</mosaic_0001>

<bundles_post_ra>
// kernel: label_smoothing_cross_entropy.1
= control target key start
LH: loop header
LB: loop body
LE: loop exit
PB: predicated region body
PF: predicated region fallthrough
CT: control target
= control target key end

     0   :  { %vm19_vm0 = vcmask 261120   ;;  %v69_v1 = vmov 0   ;;  %v35_v7 = vlaneseq  ;;  %s98_s0 = inlined_call_operand.vmem [shape: f32[8,32], index: 0, kind: input, shape index: {}]   ;;  %s99_s1 = inlined_call_operand.vmem [shape: s32[8,1], index: 1, kind: input, shape index: {}]   ;;  %s100_s2 = inlined_call_operand.vmem [shape: f32[1,8,128], index: 2, kind: output, shape index: {}]  }
   0x1   :  { %v11_v0 = vld [vmem:[%s98_s0] sm:$0xff]  ;;  %64 = vset.pattern.permute.xlu0 %v69_v1 }
   0x2   :  { %v20_v2 = vsel %vm19_vm0, %v11_v0, -inf  ;;  %v12_v3 = vld [vmem:[%s99_s1] sm:$0xff]  ;;  %v36_v8 = vand.u32 127, %v35_v7  ;;  %v32_v12 = vsel %vm19_vm0, %v11_v0, 0.0 }
   0x3   :  { %21 = vmax.xlane.f32.xlu0 %v20_v2 }
  0x19   :  { %38 = vperm.xlu0 %64, %v12_v3  }
  0x90   :  { %v22_v4 = vpop.xlane.xlu0 %21 }
  0x91   :  { %v23_v5 = vsub.f32 %v11_v0, %v22_v4 }
  0x93   :  { %v24_v6 = vmul.f32 1.442695, %v23_v5 }
  0x95   :  { %65 = vpow2.f32 %v24_v6 }
  0x98   :  { %v39_v9 = vpop.permute.xlu0 %38 }
  0x99   :  { %vm40_vm1 = vcmp.eq.s32.totalorder %v36_v8, %v39_v9 }
  0x9a   :  { %v41_v13 = vsel %vm40_vm1, %v11_v0, 0.0 }
  0x9b   :  { %v42_v14 = vsel %vm19_vm0, %v41_v13, 0.0 }
  0x9f   :  { %v66_v10 = vpop.eup %65 }
  0xa0   :  { %v26_v11 = vsel %vm19_vm0, %v66_v10, 0.0 }
  0xa1   :  { %27 = vadd.xlane.f32.xlu1 %v26_v11 }
  0xa5   :  { %33 = vadd.xlane.f32.xlu1 %v32_v12 }
  0xa9   :  { %43 = vadd.xlane.f32.xlu1 %v42_v14 }
 0x12e   :  { %v28_v15 = vpop.xlane.xlu1 %27 }
 0x12f   :  { %67 = vlog2.f32 %v28_v15 }
 0x132   :  { %v34_v16 = vpop.xlane.xlu1 %33 }
 0x136   :  { %v44_v19 = vpop.xlane.xlu1 %43 }
 0x139   :  { %v68_v17 = vpop.eup %67 }
 0x13a   :  { %v30_v18 = vmul.f32 0.6931472, %v68_v17 }
 0x13c   :  { %v31_v20 = vadd.f32 %v30_v18, %v22_v4 }
 0x13e   :  { %v45_v21 = vmul.f32 32.0, %v31_v20  ;;  %v47_v22 = vsub.f32 %v31_v20, %v44_v19 }
 0x140   :  { %v46_v23 = vsub.f32 %v45_v21, %v34_v16  ;;  %v49_v25 = vmul.f32 0.8, %v47_v22 }
 0x142   :  { %v48_v24 = vmul.f32 0.00625, %v46_v23 }
 0x144   :  { %v50_v26 = vadd.f32 %v49_v25, %v48_v24 }
 0x146   :  { %v52_v27 = vrot.slane %v50_v26, 4 }
 0x148   :  { %v53_v28 = vadd.f32 %v52_v27, %v50_v26 }
 0x14a   :  { %v54_v29 = vrot.slane %v53_v28, 2 }
 0x14c   :  { %v55_v30 = vadd.f32 %v54_v29, %v53_v28 }
 0x14e   :  { %v56_v31 = vrot.slane %v55_v30, 1 }
 0x150   :  { %v57_v32 = vadd.f32 %v56_v31, %v55_v30 }
 0x152   :  { %58 = vst [vmem:[%s100_s2] sm:$0xff] %v57_v32 }

</bundles_post_ra>
